<compile_context>
chip_gen: v7x
topology: tpu7x:2x2x1
jax: 0.10.0
libtpu: 0.0.40
codegen_flags: <defaults>
</compile_context>

<pallas_src>
import functools

import jax
import jax.numpy as jnp
import numpy as np
from jax.experimental import pallas as pl
from jax.experimental.pallas import tpu as pltpu

_LN_EPS = 1e-5
_LANE = 128


def _round_up(n, m):
    return ((n + m - 1) // m) * m


@functools.lru_cache(maxsize=None)
def _vmem_capacity_bytes():
    """Queried once per process; conservative 64 MiB (v7x per-TC) fallback."""
    try:
        info = pltpu.get_tpu_info()
        cap = int(getattr(info, "vmem_capacity_bytes", 0))
        if cap > 0:
            return cap
    except Exception:  # hardware-info query only; resolved once, not per call
        pass
    return 64 * 2 ** 20


def _layernorm_padded(y, gamma, beta, d_true, d_pad, eps=_LN_EPS):
    """Two-pass LayerNorm over the last axis of a zero-padded f32 tile.

    Padded columns of `y` must be exactly zero and gamma/beta zero-padded.
    The (y - mean) centering is masked on the padded columns so the variance
    is computed exactly over the `d_true` real columns; padded output columns
    come out as exactly zero (gamma/beta are zero there).
    """
    inv_d = 1.0 / float(d_true)
    mean = jnp.sum(y, axis=-1, keepdims=True) * inv_d
    xc = y - mean
    if d_pad != d_true:
        col = jax.lax.broadcasted_iota(jnp.int32, y.shape, y.ndim - 1)
        xc = jnp.where(col < d_true, xc, 0.0)
    var = jnp.sum(xc * xc, axis=-1, keepdims=True) * inv_d
    return xc * jax.lax.rsqrt(var + eps) * gamma + beta


def _make_adapter_kernel(layernorm_before, has_projection, d_ln, d_ln_pad,
                         compute_dtype):
    """Builds the fused Adapter kernel body (static config via closure)."""

    def kernel(*refs):
        if has_projection:
            (x_ref, wp_ref, bp_ref, w1_ref, b1_ref, w2_ref, b2_ref,
             g_ref, be_ref, o_ref) = refs
        else:
            (x_ref, w1_ref, b1_ref, w2_ref, b2_ref,
             g_ref, be_ref, o_ref) = refs

        # Activations arrive in their original dtype; keep an f32 copy for the
        # residual / LayerNorm, cast to the MXU compute dtype per-matmul only.
        x_f32 = x_ref[...].astype(jnp.float32)
        if has_projection:
            x_f32 = jnp.dot(x_f32.astype(compute_dtype), wp_ref[...],
                            preferred_element_type=jnp.float32) + bp_ref[...]

        if layernorm_before:
            h_in_f32 = _layernorm_padded(x_f32, g_ref[...], be_ref[...],
                                         d_ln, d_ln_pad)
        else:
            h_in_f32 = x_f32

        # expand_linear + ReLU (f32 accumulate / bias / relu).
        h = jnp.dot(h_in_f32.astype(compute_dtype), w1_ref[...],
                    preferred_element_type=jnp.float32) + b1_ref[...]
        h = jnp.maximum(h, 0.0)

        # shrink_linear.
        out = jnp.dot(h.astype(compute_dtype), w2_ref[...],
                      preferred_element_type=jnp.float32) + b2_ref[...]

        if not layernorm_before:
            out = _layernorm_padded(out, g_ref[...], be_ref[...], d_ln, d_ln_pad)

        # Residual: x.shape == out.shape always holds for this module
        # (projection makes x output_dim-wide; otherwise input_dim == output_dim).
        o_ref[...] = (x_f32 + out).astype(o_ref.dtype)

    return kernel


def prepare_adapter_params(params, compute_dtype=jnp.bfloat16):
    """One-time (init-time) prep: pad feature dims to multiples of 128 lanes
    and cast matmul weights to the MXU compute dtype.  Biases / LayerNorm
    params stay f32.  Returns (padded_params, meta)."""
    has_projection = "wp" in params
    if has_projection:
        din, dmid = params["wp"].shape
    else:
        din = dmid = params["w1"].shape[0]
    dh = params["w1"].shape[1]
    dout = params["w2"].shape[1]
    assert dmid == dout, "module invariant: post-projection width == output_dim"

    din_p, dmid_p, dh_p, dout_p = (_round_up(d, _LANE) for d in (din, dmid, dh, dout))

    def pad2(a, rows, cols, dtype):
        a = a.astype(dtype)
        return jnp.pad(a, ((0, rows - a.shape[0]), (0, cols - a.shape[1])))

    out = {}
    if has_projection:
        out["wp"] = pad2(params["wp"], din_p, dmid_p, compute_dtype)
        out["bp"] = pad2(params["bp"], 1, dmid_p, jnp.float32)
    out["w1"] = pad2(params["w1"], dmid_p, dh_p, compute_dtype)
    out["b1"] = pad2(params["b1"], 1, dh_p, jnp.float32)
    out["w2"] = pad2(params["w2"], dh_p, dout_p, compute_dtype)
    out["b2"] = pad2(params["b2"], 1, dout_p, jnp.float32)
    out["gamma"] = pad2(params["gamma"], 1, dout_p, jnp.float32)
    out["beta"] = pad2(params["beta"], 1, dout_p, jnp.float32)

    meta = {"d_in": din, "d_out": dout, "d_ln": dout,
            "has_projection": has_projection}
    return out, meta


def _pick_tile_m(m, tile_m_max, din_p, dmid_p, dh_p, dout_p,
                 x_itemsize, o_itemsize, c_itemsize, const_bytes, vmem_cap):
    """Largest 8-aligned row tile whose streaming + intermediate footprint fits
    (VMEM capacity - resident params - headroom)."""
    budget = vmem_cap - const_bytes - (8 << 20)
    tm = _round_up(min(tile_m_max, max(m, 8)), 8)
    while tm > 8:
        stream = 2 * tm * (din_p * x_itemsize + dout_p * o_itemsize)  # dbl-buffered tiles
        body = 4 * tm * (dmid_p + dh_p + 2 * dout_p)                  # f32 intermediates
        body += tm * c_itemsize * (dmid_p + dh_p)                     # compute-dtype casts
        if stream + body <= budget:
            break
        tm = max(8, _round_up(tm // 2, 8))
    return tm


def adapter_forward(x, params, meta, *, layernorm_before=False,
                    tile_m_max=1024, out_dtype=None):
    """Fused Adapter forward pass via one Pallas kernel, tiled over rows.

    x:      (B, S, input_dim) float array (streamed in its own dtype).
    params: output of prepare_adapter_params (padded; weights in compute dtype).
    meta:   dict from prepare_adapter_params with the true (unpadded) dims.
    """
    B, S, din = x.shape
    if din != meta["d_in"]:
        raise ValueError(f"x feature dim {din} != adapter input_dim {meta['d_in']}")
    has_projection = meta["has_projection"]
    if not has_projection and meta["d_in"] != meta["d_out"]:
        raise ValueError("input_dim != output_dim requires a projection layer")

    cdtype = params["w1"].dtype
    dmid_p, dh_p = params["w1"].shape
    dout_p = params["w2"].shape[1]
    din_p = params["wp"].shape[0] if has_projection else dmid_p
    d_out = meta["d_out"]
    d_ln = meta["d_ln"]
    out_dtype = x.dtype if out_dtype is None else jnp.dtype(out_dtype)

    const_names = (["wp", "bp"] if has_projection else []) + \
                  ["w1", "b1", "w2", "b2", "gamma", "beta"]
    const_arrays = [params[k] for k in const_names]
    const_bytes = sum(int(a.size) * a.dtype.itemsize for a in const_arrays)

    x_itemsize = jnp.dtype(x.dtype).itemsize
    o_itemsize = jnp.dtype(out_dtype).itemsize
    c_itemsize = jnp.dtype(cdtype).itemsize
    vmem_cap = _vmem_capacity_bytes()

    # ---- row tiling: biggest 8-aligned tile that fits VMEM; cdiv grid.
    m = B * S
    tm = _pick_tile_m(m, tile_m_max, din_p, dmid_p, dh_p, dout_p,
                      x_itemsize, o_itemsize, c_itemsize, const_bytes, vmem_cap)
    m_pad = _round_up(m, tm)
    grid = (m_pad // tm,)

    # No dtype cast on the host.  Zero-pad only when actually needed; padded
    # feature columns must be exactly zero for the padded-LN / padded-matmul
    # identities in the kernel to hold.
    x2 = x.reshape(m, din)
    if m_pad != m or din_p != din:
        x2 = jnp.pad(x2, ((0, m_pad - m), (0, din_p - din)))

    kernel = _make_adapter_kernel(layernorm_before, has_projection,
                                  d_ln, dout_p, cdtype)

    # ---- explicit VMEM budget, capped by queried capacity (64 MiB on v7x).
    stream_bytes = 2 * tm * (din_p * x_itemsize + dout_p * o_itemsize)
    body_bytes = 4 * tm * (dmid_p + dh_p + 2 * dout_p) + \
        tm * c_itemsize * (dmid_p + dh_p)
    need = const_bytes + stream_bytes + body_bytes
    vmem_limit = int(min(vmem_cap - (4 << 20), max(32 << 20, need + (8 << 20))))
    vmem_limit = int(max(vmem_limit, need))

    # ---- scheduler hint.
    flops = 2 * m_pad * (dmid_p * dh_p + dh_p * dout_p)
    if has_projection:
        flops += 2 * m_pad * din_p * dmid_p
    cost = pl.CostEstimate(
        flops=int(flops),
        transcendentals=int(m_pad),  # one rsqrt per row
        bytes_accessed=int(m_pad * (din_p * x_itemsize + dout_p * o_itemsize)
                           + const_bytes),
    )

    # Constants: untiled whole-array VMEM specs -> one resident copy, no
    # multi-buffering, regardless of pipeline_mode support.
    in_specs = [pl.BlockSpec((tm, din_p), lambda i: (i, 0))]
    in_specs += [pl.BlockSpec(memory_space=pltpu.MemorySpace.VMEM)
                 for _ in const_arrays]

    out2 = pl.pallas_call(
        kernel,
        out_shape=jax.ShapeDtypeStruct((m_pad, dout_p), out_dtype),
        grid=grid,
        in_specs=in_specs,
        out_specs=pl.BlockSpec((tm, dout_p), lambda i: (i, 0)),
        compiler_params=pltpu.CompilerParams(
            dimension_semantics=("parallel",),
            vmem_limit_bytes=vmem_limit,
        ),
        cost_estimate=cost,
    )(x2, *const_arrays)

    return out2[:m, :d_out].reshape(B, S, d_out)


# -------------------- pure-JAX reference (for verification) --------------------
def adapter_reference(x, params, *, layernorm_before=False,
                      compute_dtype=jnp.float32):
    """Mirrors the PyTorch module.  Math in f32; matmul operands are rounded to
    `compute_dtype` (like the kernel's MXU path) but x / residual stay f32."""

    def ln(y, gamma, beta, eps=_LN_EPS):
        mean = jnp.mean(y, axis=-1, keepdims=True)
        var = jnp.mean((y - mean) ** 2, axis=-1, keepdims=True)
        return (y - mean) * jax.lax.rsqrt(var + eps) * gamma + beta

    def dot(a, b):
        return jnp.dot(a.astype(compute_dtype), b.astype(compute_dtype),
                       preferred_element_type=jnp.float32)

    x = x.astype(jnp.float32)
    if "wp" in params:
        x = dot(x, params["wp"]) + params["bp"]
    h_in = ln(x, params["gamma"], params["beta"]) if layernorm_before else x
    h = jnp.maximum(dot(h_in, params["w1"]) + params["b1"], 0.0)
    out = dot(h, params["w2"]) + params["b2"]
    if not layernorm_before:
        out = ln(out, params["gamma"], params["beta"])
    if x.shape == out.shape:
        out = x + out
    return out


# -------------------- deterministic parameter init --------------------
def init_adapter_params(key, input_dim, output_dim, factor):
    """Mimics nn.Linear default init: U(-1/sqrt(fan_in), 1/sqrt(fan_in))."""
    params = {}
    keys = jax.random.split(key, 6)

    def linear(kw, kb, fan_in, fan_out):
        bound = 1.0 / np.sqrt(fan_in)
        w = jax.random.uniform(kw, (fan_in, fan_out), jnp.float32, -bound, bound)
        b = jax.random.uniform(kb, (1, fan_out), jnp.float32, -bound, bound)
        return w, b

    d = input_dim
    if input_dim != output_dim:
        params["wp"], params["bp"] = linear(keys[0], keys[1], input_dim, output_dim)
        d = output_dim

    params["w1"], params["b1"] = linear(keys[2], keys[3], d, d * factor)
    params["w2"], params["b2"] = linear(keys[4], keys[5], d * factor, output_dim)
    # nn.LayerNorm(normalized_shape=d, elementwise_affine=True)
    params["gamma"] = jnp.ones((1, d), jnp.float32)
    params["beta"] = jnp.zeros((1, d), jnp.float32)
    return params


if __name__ == "__main__":
    key = jax.random.PRNGKey(0)
    kx, kp, kx2, kp2 = jax.random.split(key, 4)

    # Small demo shapes: batch=2, seq=8, hidden=32, factor=4.
    B, S, D, FACTOR = 2, 8, 32, 4
    x = jax.random.normal(kx, (B, S, D), jnp.float32)
    raw = init_adapter_params(kp, input_dim=D, output_dim=D, factor=FACTOR)

    # 1) f32 compute path: strict check of the fused-kernel semantics.
    p32, m32 = prepare_adapter_params(raw, compute_dtype=jnp.float32)
    out = jax.block_until_ready(adapter_forward(x, p32, m32, layernorm_before=False))
    ref = adapter_reference(x, raw, layernorm_before=False)
    np.testing.assert_allclose(np.asarray(out), np.asarray(ref), rtol=2e-5, atol=2e-5)

    out_lnb = jax.block_until_ready(
        adapter_forward(x, p32, m32, layernorm_before=True))
    ref_lnb = adapter_reference(x, raw, layernorm_before=True)
    np.testing.assert_allclose(np.asarray(out_lnb), np.asarray(ref_lnb),
                               rtol=2e-5, atol=2e-5)

    # 2) bf16 compute path (the performance configuration): bf16 MXU operands,
    #    f32 accumulation / LayerNorm / residual (x streamed in f32).
    pbf, mbf = prepare_adapter_params(raw, compute_dtype=jnp.bfloat16)
    out_bf = jax.block_until_ready(
        adapter_forward(x, pbf, mbf, layernorm_before=False))
    ref_bf = adapter_reference(x, raw, layernorm_before=False,
                               compute_dtype=jnp.bfloat16)
    np.testing.assert_allclose(np.asarray(out_bf), np.asarray(ref_bf),
                               rtol=2e-2, atol=2e-2)

    # 3) projection path (input_dim != output_dim) with a ragged row count,
    #    exercising row padding / cdiv grid and feature padding.
    DIN2, DOUT2 = 24, 32
    x2 = jax.random.normal(kx2, (3, 5, DIN2), jnp.float32)
    raw2 = init_adapter_params(kp2, input_dim=DIN2, output_dim=DOUT2, factor=FACTOR)
    p2, m2 = prepare_adapter_params(raw2, compute_dtype=jnp.float32)
    out2 = jax.block_until_ready(adapter_forward(x2, p2, m2, layernorm_before=False))
    ref2 = adapter_reference(x2, raw2, layernorm_before=False)
    np.testing.assert_allclose(np.asarray(out2), np.asarray(ref2),
                               rtol=2e-5, atol=2e-5)

    print("KERNEL_OK")
</pallas_src>

<mosaic_0001>
module attributes {stable_mosaic.version = 11 : i64} {
  func.func @kernel(%arg0: i32, %arg1: memref<16x128xf32, #tpu.memory_space<vmem>>, %arg2: memref<128x128xf32, #tpu.memory_space<vmem>>, %arg3: memref<1x128xf32, #tpu.memory_space<vmem>>, %arg4: memref<128x128xf32, #tpu.memory_space<vmem>>, %arg5: memref<1x128xf32, #tpu.memory_space<vmem>>, %arg6: memref<1x128xf32, #tpu.memory_space<vmem>>, %arg7: memref<1x128xf32, #tpu.memory_space<vmem>>, %arg8: memref<16x128xf32, #tpu.memory_space<vmem>>) attributes {dimension_semantics = [#tpu.dimension_semantics<parallel>], iteration_bounds = array<i64: 1>, scalar_prefetch = 0 : i64, scratch_operands = 0 : i64, tpu.core_type = #tpu.core_type<tc>, window_params = [{transform_indices = @transform_0, window_bounds = array<i64: 16, 128>}, {pipeline_mode = #tpu.pipeline_mode<synchronous>, transform_indices = @transform_1, window_bounds = array<i64: 128, 128>}, {pipeline_mode = #tpu.pipeline_mode<synchronous>, transform_indices = @transform_2, window_bounds = array<i64: 1, 128>}, {pipeline_mode = #tpu.pipeline_mode<synchronous>, transform_indices = @transform_3, window_bounds = array<i64: 128, 128>}, {pipeline_mode = #tpu.pipeline_mode<synchronous>, transform_indices = @transform_4, window_bounds = array<i64: 1, 128>}, {pipeline_mode = #tpu.pipeline_mode<synchronous>, transform_indices = @transform_5, window_bounds = array<i64: 1, 128>}, {pipeline_mode = #tpu.pipeline_mode<synchronous>, transform_indices = @transform_6, window_bounds = array<i64: 1, 128>}, {transform_indices = @transform_7, window_bounds = array<i64: 16, 128>}]} {
    %c0 = arith.constant 0 : index
    %c0_0 = arith.constant 0 : index
    %0 = vector.load %arg1[%c0, %c0_0] : memref<16x128xf32, #tpu.memory_space<vmem>>, vector<16x128xf32>
    %c0_1 = arith.constant 0 : index
    %c0_2 = arith.constant 0 : index
    %1 = vector.load %arg2[%c0_1, %c0_2] : memref<128x128xf32, #tpu.memory_space<vmem>>, vector<128x128xf32>
    %cst = arith.constant dense<0.000000e+00> : vector<16x128xf32>
    %2 = tpu.matmul %0, %1, %cst {dimension_numbers = #tpu.dot_dimension_numbers<[1], [0], [0], [1], [0, 0, 1, 1], [], []>} : vector<16x128xf32>, vector<128x128xf32>, vector<16x128xf32> -> vector<16x128xf32>
    %c0_3 = arith.constant 0 : index
    %c0_4 = arith.constant 0 : index
    %3 = vector.load %arg3[%c0_3, %c0_4] : memref<1x128xf32, #tpu.memory_space<vmem>>, vector<1x128xf32>
    %4 = vector.broadcast %3 : vector<1x128xf32> to vector<16x128xf32>
    %5 = arith.addf %2, %4 : vector<16x128xf32>
    %cst_5 = arith.constant 0.000000e+00 : f32
    %6 = vector.broadcast %cst_5 : f32 to vector<16x128xf32>
    %7 = arith.maximumf %5, %6 : vector<16x128xf32>
    %c0_6 = arith.constant 0 : index
    %c0_7 = arith.constant 0 : index
    %8 = vector.load %arg4[%c0_6, %c0_7] : memref<128x128xf32, #tpu.memory_space<vmem>>, vector<128x128xf32>
    %cst_8 = arith.constant dense<0.000000e+00> : vector<16x128xf32>
    %9 = tpu.matmul %7, %8, %cst_8 {dimension_numbers = #tpu.dot_dimension_numbers<[1], [0], [0], [1], [0, 0, 1, 1], [], []>} : vector<16x128xf32>, vector<128x128xf32>, vector<16x128xf32> -> vector<16x128xf32>
    %c0_9 = arith.constant 0 : index
    %c0_10 = arith.constant 0 : index
    %10 = vector.load %arg5[%c0_9, %c0_10] : memref<1x128xf32, #tpu.memory_space<vmem>>, vector<1x128xf32>
    %11 = vector.broadcast %10 : vector<1x128xf32> to vector<16x128xf32>
    %12 = arith.addf %9, %11 : vector<16x128xf32>
    %c0_11 = arith.constant 0 : index
    %c0_12 = arith.constant 0 : index
    %13 = vector.load %arg6[%c0_11, %c0_12] : memref<1x128xf32, #tpu.memory_space<vmem>>, vector<1x128xf32>
    %c0_13 = arith.constant 0 : index
    %c0_14 = arith.constant 0 : index
    %14 = vector.load %arg7[%c0_13, %c0_14] : memref<1x128xf32, #tpu.memory_space<vmem>>, vector<1x128xf32>
    %cst_15 = arith.constant dense<0.000000e+00> : vector<16xf32>
    %15 = vector.multi_reduction <add>, %12, %cst_15 [1] : vector<16x128xf32> to vector<16xf32>
    %16 = vector.shape_cast %15 : vector<16xf32> to vector<16x1xf32>
    %cst_16 = arith.constant 3.125000e-02 : f32
    %17 = vector.broadcast %cst_16 : f32 to vector<16x1xf32>
    %18 = arith.mulf %16, %17 : vector<16x1xf32>
    %19 = vector.broadcast %18 : vector<16x1xf32> to vector<16x128xf32>
    %20 = arith.subf %12, %19 : vector<16x128xf32>
    %21 = tpu.iota {dimensions = array<i32: 1>} : vector<16x128xi32>
    %c32_i32 = arith.constant 32 : i32
    %22 = vector.broadcast %c32_i32 : i32 to vector<16x128xi32>
    %23 = arith.cmpi slt, %21, %22 : vector<16x128xi32>
    %cst_17 = arith.constant 0.000000e+00 : f32
    %24 = vector.broadcast %cst_17 : f32 to vector<16x128xf32>
    %25 = arith.select %23, %20, %24 : vector<16x128xi1>, vector<16x128xf32>
    %26 = arith.mulf %25, %25 : vector<16x128xf32>
    %cst_18 = arith.constant dense<0.000000e+00> : vector<16xf32>
    %27 = vector.multi_reduction <add>, %26, %cst_18 [1] : vector<16x128xf32> to vector<16xf32>
    %28 = vector.shape_cast %27 : vector<16xf32> to vector<16x1xf32>
    %cst_19 = arith.constant 3.125000e-02 : f32
    %29 = vector.broadcast %cst_19 : f32 to vector<16x1xf32>
    %30 = arith.mulf %28, %29 : vector<16x1xf32>
    %cst_20 = arith.constant 9.99999974E-6 : f32
    %31 = vector.broadcast %cst_20 : f32 to vector<16x1xf32>
    %32 = arith.addf %30, %31 : vector<16x1xf32>
    %33 = math.rsqrt %32 : vector<16x1xf32>
    %34 = vector.broadcast %33 : vector<16x1xf32> to vector<16x128xf32>
    %35 = arith.mulf %25, %34 : vector<16x128xf32>
    %36 = vector.broadcast %13 : vector<1x128xf32> to vector<16x128xf32>
    %37 = arith.mulf %35, %36 : vector<16x128xf32>
    %38 = vector.broadcast %14 : vector<1x128xf32> to vector<16x128xf32>
    %39 = arith.addf %37, %38 : vector<16x128xf32>
    %40 = arith.addf %0, %39 : vector<16x128xf32>
    %c0_21 = arith.constant 0 : index
    %c0_22 = arith.constant 0 : index
    %41 = vector.load %arg8[%c0_21, %c0_22] : memref<16x128xf32, #tpu.memory_space<vmem>>, vector<16x128xf32>
    tpu.vector_store %arg8[%c0_21, %c0_22], %40 {strides = array<i32>} : memref<16x128xf32, #tpu.memory_space<vmem>>, vector<16x128xf32>,
    return
  }
  func.func @transform_0(%arg0: i32) -> (i32, i32) {
    %c0_i32 = arith.constant 0 : i32
    %c0_i32_0 = arith.constant 0 : i32
    return %arg0, %c0_i32 : i32, i32
  }
  func.func @transform_1(%arg0: i32) -> (i32, i32) {
    %c0_i32 = arith.constant 0 : i32
    %c0_i32_0 = arith.constant 0 : i32
    %c0_i32_1 = arith.constant 0 : i32
    return %c0_i32, %c0_i32_0 : i32, i32
  }
  func.func @transform_2(%arg0: i32) -> (i32, i32) {
    %c0_i32 = arith.constant 0 : i32
    %c0_i32_0 = arith.constant 0 : i32
    %c0_i32_1 = arith.constant 0 : i32
    return %c0_i32, %c0_i32_0 : i32, i32
  }
  func.func @transform_3(%arg0: i32) -> (i32, i32) {
    %c0_i32 = arith.constant 0 : i32
    %c0_i32_0 = arith.constant 0 : i32
    %c0_i32_1 = arith.constant 0 : i32
    return %c0_i32, %c0_i32_0 : i32, i32
  }
  func.func @transform_4(%arg0: i32) -> (i32, i32) {
    %c0_i32 = arith.constant 0 : i32
    %c0_i32_0 = arith.constant 0 : i32
    %c0_i32_1 = arith.constant 0 : i32
    return %c0_i32, %c0_i32_0 : i32, i32
  }
  func.func @transform_5(%arg0: i32) -> (i32, i32) {
    %c0_i32 = arith.constant 0 : i32
    %c0_i32_0 = arith.constant 0 : i32
    %c0_i32_1 = arith.constant 0 : i32
    return %c0_i32, %c0_i32_0 : i32, i32
  }
  func.func @transform_6(%arg0: i32) -> (i32, i32) {
    %c0_i32 = arith.constant 0 : i32
    %c0_i32_0 = arith.constant 0 : i32
    %c0_i32_1 = arith.constant 0 : i32
    return %c0_i32, %c0_i32_0 : i32, i32
  }
  func.func @transform_7(%arg0: i32) -> (i32, i32) {
    %c0_i32 = arith.constant 0 : i32
    %c0_i32_0 = arith.constant 0 : i32
    return %arg0, %c0_i32 : i32, i32
  }
}

</mosaic_0001>

<bundles_post_ra>
// kernel: tpu_custom_call.1
= control target key start
LH: loop header
LB: loop body
LE: loop exit
PB: predicated region body
PF: predicated region fallthrough
CT: control target
= control target key end

     0   :  { %12 = vsyncpa [#allocation3], 0  ;;  %s742_s0 = inlined_call_operand.hbm [shape: f32[16,128], index: 0, kind: input, shape index: {}]   ;;  %s743_s1 = inlined_call_operand.hbm [shape: f32[128,128], index: 1, kind: input, shape index: {}]   ;;  %s744_s2 = inlined_call_operand.vmem [shape: f32[1,128], index: 2, kind: input, shape index: {}]   ;;  %s745_s3 = inlined_call_operand.hbm [shape: f32[128,128], index: 3, kind: input, shape index: {}]   ;;  %s746_s4 = inlined_call_operand.vmem [shape: f32[1,128], index: 4, kind: input, shape index: {}]   ;;  %s747_s5 = inlined_call_operand.vmem [shape: f32[1,128], index: 5, kind: input, shape index: {}]   ;;  %s748_s6 = inlined_call_operand.vmem [shape: f32[1,128], index: 6, kind: input, shape index: {}]   ;;  %s749_s7 = inlined_call_operand.hbm [shape: f32[16,128], index: 7, kind: output, shape index: {}]  }
   0x1   :  { %13 = vsyncpa [#allocation6], 0 }
   0x2   :  { %14 = vsyncpa [#allocation4], 0  ;;  %s613_s24 = smov [#allocation5]   ;;  %s614_s26 = smov [#allocation2]  }
   0x3   :  { %s32_s25 = sshll.u32 %s613_s24, 4  ;;  %s20_s27 = sshll.u32 %s614_s26, 4  ;;  %s33_s25 = int_to_ptr.vmem [resolvable:$true] %s32_s25  ;;  %s659_s27 = int_to_ptr.vmem [resolvable:$true] %s20_s27 }
   0x4   :  { %s519_s30 = scalar_lea.hbm %s743_s1, 2048 }
   0x5   :  { %p520_p0 = scmp.ne.s32.totalorder %s743_s1, %s519_s30  ;;  %p523_p1 = scmp.lt.u32.totalorder %s519_s30, %s743_s1 }
   0x7   :  { %p525_p2 = pnand %p523_p1, %p520_p0 }
   0x9   :  { %528 = shalt.err (!%p525_p2)
}
   0xa   :  { %s529_s12 = scalar_lea.vmem %s33_s25, 2048  ;;  %p534_p4 = scmp.lt.s32.totalorder %s33_s25, %s33_s25 }
   0xb   :  { %p530_p3 = scmp.ne.s32.totalorder %s33_s25, %s529_s12  ;;  %p535_p5 = scmp.lt.s32.totalorder %s529_s12, %s529_s12 }
   0xd   :  { %p536_p6 = por %p535_p5, %p534_p4 }
   0xf   :  { %p537_p7 = pnand %p536_p6, %p530_p3 }
  0x11   :  { %540 = shalt.err (!%p537_p7)
}
  0x12   :  { %s615_s13 = smov 128   ;;  %s616_s14 = smov 8  }
  0x13   :  { %38 = dma.hbm_to_vmem [thread:$0]  %s743_s1, 2048, %s33_s25, [#allocation6], %s615_s13, %s615_s13, %s616_s14  }
  0x14   :  { %s541_s19 = scalar_lea.hbm %s742_s0, 256 }
  0x15   :  { %p542_p8 = scmp.ne.s32.totalorder %s742_s0, %s541_s19  ;;  %p545_p9 = scmp.lt.u32.totalorder %s541_s19, %s742_s0 }
  0x17   :  { %p547_p10 = pnand %p545_p9, %p542_p8 }
  0x19   :  { %550 = shalt.err (!%p547_p10)
}
  0x1a   :  { %s551_s24 = scalar_lea.vmem %s659_s27, 256  ;;  %p556_p12 = scmp.lt.s32.totalorder %s659_s27, %s659_s27 }
  0x1b   :  { %p552_p11 = scmp.ne.s32.totalorder %s659_s27, %s551_s24  ;;  %p557_p13 = scmp.lt.s32.totalorder %s551_s24, %s551_s24 }
  0x1d   :  { %p558_p0 = por %p557_p13, %p556_p12 }
  0x1f   :  { %p559_p1 = pnand %p558_p0, %p552_p11 }
  0x21   :  { %562 = shalt.err (!%p559_p1)
}
  0x22   :  { %26 = dma.hbm_to_vmem [thread:$0]  %s742_s0, 256, %s659_s27, [#allocation3], %s615_s13, %s615_s13, %s616_s14  }
  0x23   :  { %s617_s26 = smov [#allocation7]   ;;  %s563_s8 = scalar_lea.hbm %s745_s3, 2048 }
  0x24   :  { %s46_s28 = sshll.u32 %s617_s26, 4  ;;  %p564_p2 = scmp.ne.s32.totalorder %s745_s3, %s563_s8  ;;  %s47_s28 = int_to_ptr.vmem [resolvable:$true] %s46_s28 }
  0x25   :  { %p567_p3 = scmp.lt.u32.totalorder %s563_s8, %s745_s3 }
  0x27   :  { %p569_p4 = pnand %p567_p3, %p564_p2 }
  0x29   :  { %572 = shalt.err (!%p569_p4)
}
  0x2a   :  { %s573_s15 = scalar_lea.vmem %s47_s28, 2048  ;;  %p578_p6 = scmp.lt.s32.totalorder %s47_s28, %s47_s28 }
  0x2b   :  { %p574_p5 = scmp.ne.s32.totalorder %s47_s28, %s573_s15  ;;  %p579_p7 = scmp.lt.s32.totalorder %s573_s15, %s573_s15 }
  0x2d   :  { %p580_p8 = por %p579_p7, %p578_p6 }
  0x2f   :  { %p581_p9 = pnand %p580_p8, %p574_p5 }
  0x31   :  { %584 = shalt.err (!%p581_p9)
}
  0x32   :  { %52 = dma.hbm_to_vmem [thread:$0]  %s745_s3, 2048, %s47_s28, [#allocation6], %s615_s13, %s615_s13, %s616_s14  }
  0x33   :  { %607 = dma.done.wait [#allocation3], 256  }
  0x34   :  { %608 = vsyncadd [#allocation3], 4294967040 }
  0x35   :  { %609 = dma.done.wait [#allocation6], 4096  }
  0x36   :  { %610 = vsyncadd [#allocation6], 4294963200  ;;  %v70_v0 = vld [vmem:[#allocation5] sm:$0xff]  ;;  %v71_v1 = vld [vmem:[#allocation5 + $0x8] sm:$0xff]  ;;  %v278_v62 = vlaneseq  ;;  %s618_s21 = smov [#allocation8]  }
  0x37   :  { %v72_v2 = vld [vmem:[#allocation5 + $0x10] sm:$0xff]  ;;  %v445_v3 = vpack.c.bf16 %v71_v1, %v70_v0  ;;  %v73_v4 = vld [vmem:[#allocation5 + $0x18] sm:$0xff]  ;;  %v74_v6 = vld [vmem:[#allocation5 + $0x20] sm:$0xff]  ;;  %s322_s22 = sshll.u32 %s618_s21, 4  ;;  %s323_s22 = int_to_ptr.vmem [resolvable:$true] %s322_s22 }
  0x38   :  { %v449_v5 = vpack.c.bf16 %v73_v4, %v72_v2  ;;  %v75_v7 = vld [vmem:[#allocation5 + $0x28] sm:$0xff]  ;;  %v76_v9 = vld [vmem:[#allocation5 + $0x30] sm:$0xff]  ;;  %v77_v10 = vld [vmem:[#allocation5 + $0x38] sm:$0xff]  ;;  %v279_v63 = vand.u32 127, %v278_v62  ;;  %p590_p11 = scmp.lt.s32.totalorder %s323_s22, %s323_s22 }
  0x39   :  { %446 = vmatprep.subr.bf16.mxu0 %v445_v3  ;;  %v453_v8 = vpack.c.bf16 %v75_v7, %v74_v6  ;;  %v711_v11 = vld [vmem:[#allocation2] sm:$0xff]  ;;  %v170_v12 = vld [vmem:[#allocation7] sm:$0xff]  ;;  %v171_v13 = vld [vmem:[#allocation7 + $0x8] sm:$0xff]  ;;  %v457_v20 = vpack.c.bf16 %v77_v10, %v76_v9 }
  0x3a   :  { %448 = vmatpush3.bf16.msra.mxu0 %v445_v3  ;;  %407 = vmatprep.mubr.f32.mxu0 %v711_v11  ;;  %v172_v14 = vld [vmem:[#allocation7 + $0x10] sm:$0xff]  ;;  %v477_v15 = vpack.c.bf16 %v171_v13, %v170_v12  ;;  %v173_v16 = vld [vmem:[#allocation7 + $0x18] sm:$0xff]  ;;  %v174_v18 = vld [vmem:[#allocation7 + $0x20] sm:$0xff]  ;;  %vm280_vm0 = vcmp.lt.s32.totalorder %v279_v63, 32 }
  0x3b   :  { %450 = vmatprep.subr.bf16.mxu0 %v449_v5  ;;  %v481_v17 = vpack.c.bf16 %v173_v16, %v172_v14  ;;  %v175_v19 = vld [vmem:[#allocation7 + $0x28] sm:$0xff]  ;;  %v78_v21 = vld [vmem:[#allocation5 + $0x40] sm:$0xff]  ;;  %v176_v24 = vld [vmem:[#allocation7 + $0x30] sm:$0xff] }
  0x3c   :  { %478 = vmatprep.subr.bf16.mxu1 %v477_v15  ;;  %v79_v22 = vld [vmem:[#allocation5 + $0x48] sm:$0xff]  ;;  %v485_v23 = vpack.c.bf16 %v175_v19, %v174_v18  ;;  %v177_v25 = vld [vmem:[#allocation7 + $0x38] sm:$0xff]  ;;  %v80_v27 = vld [vmem:[#allocation5 + $0x50] sm:$0xff] }
  0x3d   :  { %480 = vmatpush3.bf16.msra.mxu1 %v477_v15  ;;  %v461_v26 = vpack.c.bf16 %v79_v22, %v78_v21  ;;  %v81_v28 = vld [vmem:[#allocation5 + $0x58] sm:$0xff]  ;;  %v489_v29 = vpack.c.bf16 %v177_v25, %v176_v24  ;;  %v178_v30 = vld [vmem:[#allocation7 + $0x40] sm:$0xff]  ;;  %v179_v31 = vld [vmem:[#allocation7 + $0x48] sm:$0xff] }
  0x3e   :  { %452 = vmatpush3.bf16.msra.mxu0 %v449_v5  ;;  %482 = vmatprep.subr.bf16.mxu1 %v481_v17  ;;  %v465_v32 = vpack.c.bf16 %v81_v28, %v80_v27  ;;  %v82_v33 = vld [vmem:[#allocation5 + $0x60] sm:$0xff]  ;;  %v83_v34 = vld [vmem:[#allocation5 + $0x68] sm:$0xff]  ;;  %v493_v35 = vpack.c.bf16 %v179_v31, %v178_v30  ;;  %v180_v36 = vld [vmem:[#allocation7 + $0x50] sm:$0xff] }
  0x3f   :  { %454 = vmatprep.subr.bf16.mxu0 %v453_v8  ;;  %v181_v37 = vld [vmem:[#allocation7 + $0x58] sm:$0xff]  ;;  %v469_v38 = vpack.c.bf16 %v83_v34, %v82_v33  ;;  %v84_v39 = vld [vmem:[#allocation5 + $0x70] sm:$0xff]  ;;  %v182_v42 = vld [vmem:[#allocation7 + $0x60] sm:$0xff] }
  0x40   :  { %v85_v40 = vld [vmem:[#allocation5 + $0x78] sm:$0xff]  ;;  %v497_v41 = vpack.c.bf16 %v181_v37, %v180_v36  ;;  %v183_v43 = vld [vmem:[#allocation7 + $0x68] sm:$0xff]  ;;  %v184_v47 = vld [vmem:[#allocation7 + $0x70] sm:$0xff] }
  0x41   :  { %484 = vmatpush3.bf16.msra.mxu1 %v481_v17  ;;  %v473_v44 = vpack.c.bf16 %v85_v40, %v84_v39  ;;  %v501_v45 = vpack.c.bf16 %v183_v43, %v182_v42  ;;  %v69_v46 = vld [vmem:[#allocation2 + $0x8] sm:$0xff]  ;;  %v335_v50 = vld [vmem:[%s744_s2] ss:$0 sm:$0xff] }
  0x42   :  { %456 = vmatpush3.bf16.msra.mxu0 %v453_v8  ;;  %486 = vmatprep.subr.bf16.mxu1 %v485_v23  ;;  %v185_v48 = vld [vmem:[#allocation7 + $0x78] sm:$0xff]  ;;  %v336_v57 = vld [vmem:[%s746_s4] ss:$0 sm:$0xff] }
  0x43   :  { %458 = vmatprep.subr.bf16.mxu0 %v457_v20  ;;  %v505_v49 = vpack.c.bf16 %v185_v48, %v184_v47  ;;  %v337_v18 = vld [vmem:[%s747_s5] ss:$0 sm:$0xff]  ;;  %s585_s5 = scalar_lea.vmem %s323_s22, 256 }
  0x44   :  { %p586_p10 = scmp.ne.s32.totalorder %s323_s22, %s585_s5  ;;  %p591_p12 = scmp.lt.s32.totalorder %s585_s5, %s585_s5 }
  0x45   :  { %488 = vmatpush3.bf16.msra.mxu1 %v485_v23 }
  0x46   :  { %460 = vmatpush3.bf16.msra.mxu0 %v457_v20  ;;  %490 = vmatprep.subr.bf16.mxu1 %v489_v29  ;;  %v338_v20 = vld [vmem:[%s748_s6] ss:$0 sm:$0xff]  ;;  %p592_p13 = por %p591_p12, %p590_p11 }
  0x47   :  { %462 = vmatprep.subr.bf16.mxu0 %v461_v26 }
  0x48   :  { %p593_p0 = pnand %p592_p13, %p586_p10 }
  0x49   :  { %492 = vmatpush3.bf16.msra.mxu1 %v489_v29 }
  0x4a   :  { %464 = vmatpush3.bf16.msra.mxu0 %v461_v26  ;;  %494 = vmatprep.subr.bf16.mxu1 %v493_v35 }
  0x4b   :  { %466 = vmatprep.subr.bf16.mxu0 %v465_v32 }
  0x4d   :  { %496 = vmatpush3.bf16.msra.mxu1 %v493_v35 }
  0x4e   :  { %468 = vmatpush3.bf16.msra.mxu0 %v465_v32  ;;  %498 = vmatprep.subr.bf16.mxu1 %v497_v41 }
  0x4f   :  { %470 = vmatprep.subr.bf16.mxu0 %v469_v38 }
  0x51   :  { %500 = vmatpush3.bf16.msra.mxu1 %v497_v41 }
  0x52   :  { %472 = vmatpush3.bf16.msra.mxu0 %v469_v38  ;;  %502 = vmatprep.subr.bf16.mxu1 %v501_v45 }
  0x53   :  { %474 = vmatprep.subr.bf16.mxu0 %v473_v44 }
  0x55   :  { %504 = vmatpush3.bf16.msra.mxu1 %v501_v45 }
  0x56   :  { %476 = vmatpush3.bf16.msra.mxu0 %v473_v44  ;;  %506 = vmatprep.subr.bf16.mxu1 %v505_v49 }
  0x59   :  { %408 = vmatmul.mubr.f32.vlgmr.msra.gmra.mrb[0].mxu0 %v69_v46  ;;  %508 = vmatpush3.bf16.msra.mxu1 %v505_v49 }
 0x12c   :  { %v409_v51 = vpop.f32.mrb[0].mxu0 }
 0x12d   :  { %v165_v52 = vadd.f32 %v409_v51, %v335_v50  ;;  %v159_v53 = vpop.f32.mrb[1].mxu0 }
 0x12e   :  { %v160_v54 = vadd.f32 %v335_v50, %v159_v53 }
 0x12f   :  { %v169_v56 = vmax.f32 %v165_v52, 0.0 }
 0x130   :  { %v168_v55 = vmax.f32 %v160_v54, 0.0 }
 0x132   :  { %442 = vmatprep.mubr.f32.mxu1 %v168_v55 }
 0x133   :  { %443 = vmatmul.mubr.f32.vlgmr.msra.gmra.mrb[0].mxu1 %v169_v56 }
 0x206   :  { %v444_v58 = vpop.f32.mrb[0].mxu1 }
 0x207   :  { %v259_v59 = vpop.f32.mrb[1].mxu1  ;;  %v265_v61 = vadd.f32 %v444_v58, %v336_v57 }
 0x208   :  { %v260_v60 = vadd.f32 %v336_v57, %v259_v59 }
 0x20a   :  { %270 = vadd.xlane.f32.xlu0 %v260_v60 }
 0x20e   :  { %272 = vadd.xlane.f32.xlu0 %v265_v61 }
 0x297   :  { %v271_v0 = vpop.xlane.xlu0 %270 }
 0x298   :  { %v274_v1 = vmul.f32 0.03125, %v271_v0 }
 0x29a   :  { %v276_v2 = vsub.f32 %v260_v60, %v274_v1 }
 0x29b   :  { %v273_v3 = vpop.xlane.xlu0 %272 }
 0x29c   :  { %v275_v4 = vmul.f32 0.03125, %v273_v3  ;;  %v281_v5 = vsel %vm280_vm0, %v276_v2, 0.0 }
 0x29d   :  { %v283_v6 = vmul.f32 %v281_v5, %v281_v5 }
 0x29e   :  { %v277_v7 = vsub.f32 %v265_v61, %v275_v4 }
 0x29f   :  { %285 = vadd.xlane.f32.xlu1 %v283_v6 }
 0x2a0   :  { %v282_v8 = vsel %vm280_vm0, %v277_v7, 0.0 }
 0x2a1   :  { %v284_v9 = vmul.f32 %v282_v8, %v282_v8 }
 0x2a3   :  { %287 = vadd.xlane.f32.xlu1 %v284_v9 }
 0x32c   :  { %v286_v10 = vpop.xlane.xlu1 %285 }
 0x32d   :  { %v289_v12 = vmul.f32 0.03125, %v286_v10 }
 0x32f   :  { %v291_v13 = vadd.f32 1e-05, %v289_v12 }
 0x330   :  { %v288_v14 = vpop.xlane.xlu1 %287 }
 0x331   :  { %515 = vrsqrt.f32 %v291_v13  ;;  %v290_v15 = vmul.f32 0.03125, %v288_v14 }
 0x333   :  { %v292_v16 = vadd.f32 1e-05, %v290_v15 }
 0x335   :  { %517 = vrsqrt.f32 %v292_v16 }
 0x33b   :  { %v516_v17 = vpop.eup %515 }
 0x33c   :  { %v295_v19 = vmul.f32 %v516_v17, %v281_v5 }
 0x33e   :  { %v303_v21 = vmul.f32 %v337_v18, %v295_v19 }
 0x33f   :  { %v518_v22 = vpop.eup %517 }
 0x340   :  { %v296_v23 = vmul.f32 %v518_v22, %v282_v8  ;;  %v311_v24 = vadd.f32 %v338_v20, %v303_v21 }
 0x342   :  { %v304_v25 = vmul.f32 %v337_v18, %v296_v23  ;;  %v313_v26 = vadd.f32 %v311_v24, %v711_v11 }
 0x344   :  { %v312_v27 = vadd.f32 %v338_v20, %v304_v25  ;;  %315 = vst [vmem:[#allocation8] sm:$0xff] %v313_v26 }
 0x346   :  { %v314_v28 = vadd.f32 %v312_v27, %v69_v46 }
 0x348   :  { %316 = vst [vmem:[#allocation8 + $0x8] sm:$0xff] %v314_v28 }
 0x349   :  { %596 = shalt.err (!%p593_p0)
}
 0x34a   :  { %s597_s24 = scalar_lea.hbm %s749_s7, 256 }
 0x34b   :  { %p598_p1 = scmp.ne.s32.totalorder %s749_s7, %s597_s24  ;;  %p601_p2 = scmp.lt.u32.totalorder %s597_s24, %s749_s7 }
 0x34d   :  { %p603_p3 = pnand %p601_p2, %p598_p1 }
 0x34f   :  { %606 = shalt.err (!%p603_p3)
}
 0x350   :  { %328 = dma.vmem_to_hbm [thread:$0]  %s323_s22, 256, %s749_s7, [#allocation4], %s615_s13, %s615_s13, %s616_s14  }
 0x351   :  { %611 = dma.done.wait [#allocation4], 256  }
 0x352   :  { %612 = vsyncadd [#allocation4], 4294967040 }
 0x353   :  { %332 = vsyncpa [#allocation3], 1 }
 0x354   :  { %333 = vsyncpa [#allocation6], 1 }
 0x355   :  { %334 = vsyncpa [#allocation4], 1 }

</bundles_post_ra>
